<compile_context>
chip_gen: v5e
topology: v5e:2x2
jax: 0.10.0
libtpu: 0.0.40
codegen_flags: <defaults>
</compile_context>

<pallas_src>
import functools
import math

import jax
import jax.numpy as jnp
from jax.experimental import pallas as pl
from jax.experimental.pallas import tpu as pltpu

_LANE = 128
_TILE = 512            # target row / contraction tile (multiple of 128)


def _round_up(v: int, m: int) -> int:
    return ((v + m - 1) // m) * m


def _pick_tile(n: int, preferred: int) -> int:
    """Largest multiple of 128 that divides n and is <= preferred (n % 128 == 0)."""
    t = max(min(preferred, n) - (min(preferred, n) % _LANE), _LANE)
    while n % t != 0:
        t -= _LANE
    return t


def _vmem_budget_bytes() -> int:
    """Generation-aware VMEM budget: ~48 MiB on v7x (64 MiB phys), ~96 MiB on v5e/v6e."""
    try:
        phys = int(pltpu.get_tpu_info().vmem_capacity_bytes)
    except Exception:
        phys = 64 * 1024 * 1024      # conservative (v7x per-TC VMEM)
    return min(int(phys * 0.75), 96 * 1024 * 1024)


def _pad(arr, target_shape):
    pads = tuple((0, t - s) for s, t in zip(arr.shape, target_shape))
    if any(p[1] for p in pads):
        arr = jnp.pad(arr, pads)
    return arr


# ---------------------------------------------------------------------------
# Kernels
# ---------------------------------------------------------------------------
def _gcn_fused_kernel(adj_ref, x_ref, w_ref, b_ref, o_ref, acc_ref, *,
                      tk, feat_resident, compute_dtype):
    """acc (+)= adj_tile @ x_slice over K; out = acc @ W + bias on the last K step."""
    k = pl.program_id(2)

    adj_t = adj_ref[0].astype(compute_dtype)              # VPU cast, hidden under MXU/DMA
    if feat_resident:
        start = pl.multiple_of(k * tk, tk)
        x_t = x_ref[0, pl.ds(start, tk), :].astype(compute_dtype)
    else:
        x_t = x_ref[0].astype(compute_dtype)
    prod = jnp.dot(adj_t, x_t, preferred_element_type=jnp.float32)

    @pl.when(k == 0)
    def _init():
        acc_ref[...] = prod          # no zero-fill + reload

    @pl.when(k > 0)
    def _accum():
        acc_ref[...] += prod

    @pl.when(k == pl.num_programs(2) - 1)
    def _finalize():
        out = jnp.dot(acc_ref[...].astype(compute_dtype), w_ref[...],
                      preferred_element_type=jnp.float32)
        o_ref[0] = (out + b_ref[...]).astype(o_ref.dtype)


def _gcn_agg_kernel(adj_ref, h_ref, b_ref, o_ref, acc_ref, *,
                    tk, feat_resident, compute_dtype):
    """acc (+)= adj_tile @ h_slice (h = x @ W precomputed); out = acc + bias at last K."""
    k = pl.program_id(2)

    adj_t = adj_ref[0].astype(compute_dtype)
    if feat_resident:
        start = pl.multiple_of(k * tk, tk)
        h_t = h_ref[0, pl.ds(start, tk), :]
    else:
        h_t = h_ref[0]
    prod = jnp.dot(adj_t, h_t, preferred_element_type=jnp.float32)

    @pl.when(k == 0)
    def _init():
        acc_ref[...] = prod

    @pl.when(k > 0)
    def _accum():
        acc_ref[...] += prod

    @pl.when(k == pl.num_programs(2) - 1)
    def _finalize():
        o_ref[0] = (acc_ref[...] + b_ref[...]).astype(o_ref.dtype)


def _project_kernel(x_ref, w_ref, h_ref, acc_ref, *, compute_dtype):
    """Row-tiled, D_in-tiled feature projection h = x @ W."""
    k = pl.program_id(1)
    prod = jnp.dot(x_ref[...].astype(compute_dtype), w_ref[...],
                   preferred_element_type=jnp.float32)

    @pl.when(k == 0)
    def _init():
        acc_ref[...] = prod

    @pl.when(k > 0)
    def _accum():
        acc_ref[...] += prod

    @pl.when(k == pl.num_programs(1) - 1)
    def _finalize():
        h_ref[...] = acc_ref[...].astype(h_ref.dtype)


# ---------------------------------------------------------------------------
# Wrappers
# ---------------------------------------------------------------------------
def _project(x2d, w, compute_dtype):
    """x2d: (R, D_in_pad) f32 @ w: (D_in_pad, D_out_pad) -> (R, D_out_pad) compute_dtype."""
    R, d_in = x2d.shape
    d_out = w.shape[1]
    tr = _pick_tile(R, _TILE)
    tkd = _pick_tile(d_in, _TILE)
    kernel = functools.partial(_project_kernel, compute_dtype=compute_dtype)
    return pl.pallas_call(
        kernel,
        out_shape=jax.ShapeDtypeStruct((R, d_out), compute_dtype),
        grid_spec=pltpu.PrefetchScalarGridSpec(
            num_scalar_prefetch=0,
            grid=(R // tr, d_in // tkd),
            in_specs=[
                pl.BlockSpec((tr, tkd), lambda r, k: (r, k)),
                pl.BlockSpec((tkd, d_out), lambda r, k: (k, 0)),
            ],
            out_specs=pl.BlockSpec((tr, d_out), lambda r, k: (r, 0)),
            scratch_shapes=[pltpu.VMEM((tr, d_out), jnp.float32)],
        ),
        compiler_params=pltpu.CompilerParams(
            dimension_semantics=("parallel", "arbitrary"),
            vmem_limit_bytes=_vmem_budget_bytes(),
        ),
    )(x2d, w)


def graph_convolution(x, adj, weight, bias=None, *, use_bf16=True):
    """Forward of the PyTorch GraphConvolution module.

    x: (B, N, D_in) f32, adj: (B, N, N) f32, weight: (D_in, D_out) f32,
    bias: optional (D_out,) f32.  Returns (B, N, D_out) in x.dtype.
    """
    B, N, D_in = x.shape
    assert adj.shape == (B, N, N), "adj must be (B, N, N)"
    D_in_w, D_out = weight.shape
    assert D_in_w == D_in, "weight first dim must match feature dim"
    out_dtype = x.dtype
    compute_dtype = jnp.bfloat16 if use_bf16 else jnp.float32
    c_size = jnp.dtype(compute_dtype).itemsize

    # ---- pad to lane/tile friendly shapes (f32 adj/x; zeros don't change math) ----
    N_pad = _round_up(N, _LANE) if N <= _TILE else _round_up(N, _TILE)
    D_in_pad = _round_up(D_in, _LANE)
    D_out_pad = _round_up(D_out, _LANE)

    adj_p = _pad(adj.astype(jnp.float32), (B, N_pad, N_pad))       # stays f32 in HBM
    x_p = _pad(x.astype(jnp.float32), (B, N_pad, D_in_pad))        # stays f32 in HBM
    w_p = _pad(weight.astype(compute_dtype), (D_in_pad, D_out_pad))
    if bias is not None:
        b_p = _pad(bias.astype(jnp.float32).reshape(1, D_out), (1, D_out_pad))
    else:
        b_p = jnp.zeros((1, D_out_pad), jnp.float32)

    # ---- tile plan ----
    TM = min(_TILE, N_pad)
    TK = min(_TILE, N_pad)
    # v7x megacore occupancy: need >= 2 parallel row tiles when possible.
    if B * (N_pad // TM) < 2 and N_pad % (2 * _LANE) == 0:
        TM = N_pad // 2
    budget = _vmem_budget_bytes()

    # ---- association order: run the N^2 aggregation against the narrower width ----
    w_dbuf = D_in_pad * D_out_pad * c_size * 2          # resident W, double-buffered
    fuse_projection = (D_in_pad <= D_out_pad) and (w_dbuf <= budget // 4)

    if fuse_projection:
        feat = x_p                                      # f32; cast per tile in-kernel
        feat_width = D_in_pad
        feat_itemsize = 4
    else:
        # Project first: h = x @ W (narrower width), kept in compute dtype for the
        # aggregation (halves its HBM traffic / resident footprint).
        h2d = _project(x_p.reshape(B * N_pad, D_in_pad), w_p, compute_dtype)
        feat = h2d.reshape(B, N_pad, D_out_pad)
        feat_width = D_out_pad
        feat_itemsize = c_size

    # ---- resident-vs-streamed feature matrix (avoid re-streaming per row tile) ----
    def vmem_estimate(resident):
        adj_b = TM * TK * 4 * 2
        feat_b = (N_pad if resident else TK) * feat_width * feat_itemsize * 2
        w_b = w_dbuf if fuse_projection else 0
        out_b = TM * D_out_pad * 4 * 2
        acc_b = TM * feat_width * 4
        return adj_b + feat_b + w_b + out_b + acc_b

    feat_resident = vmem_estimate(True) <= int(budget * 0.85)
    vmem_limit = min(budget, max(vmem_estimate(feat_resident) + (4 << 20), 32 << 20))

    grid = (B, N_pad // TM, N_pad // TK)

    adj_spec = pl.BlockSpec((1, TM, TK), lambda b, i, k: (b, i, k))
    if feat_resident:
        feat_spec = pl.BlockSpec((1, N_pad, feat_width), lambda b, i, k: (b, 0, 0))
    else:
        feat_spec = pl.BlockSpec((1, TK, feat_width), lambda b, i, k: (b, k, 0))
    bias_spec = pl.BlockSpec((1, D_out_pad), lambda b, i, k: (0, 0))
    out_spec = pl.BlockSpec((1, TM, D_out_pad), lambda b, i, k: (b, i, 0))

    if fuse_projection:
        kernel = functools.partial(_gcn_fused_kernel, tk=TK,
                                   feat_resident=feat_resident,
                                   compute_dtype=compute_dtype)
        inputs = (adj_p, feat, w_p, b_p)
        in_specs = [adj_spec, feat_spec,
                    pl.BlockSpec((D_in_pad, D_out_pad), lambda b, i, k: (0, 0)),
                    bias_spec]
        flops = 2 * B * N_pad * N_pad * D_in_pad + 2 * B * N_pad * D_in_pad * D_out_pad
    else:
        kernel = functools.partial(_gcn_agg_kernel, tk=TK,
                                   feat_resident=feat_resident,
                                   compute_dtype=compute_dtype)
        inputs = (adj_p, feat, b_p)
        in_specs = [adj_spec, feat_spec, bias_spec]
        flops = 2 * B * N_pad * N_pad * D_out_pad

    feat_reads = 1 if feat_resident else (N_pad // TM)
    bytes_accessed = (adj_p.size * 4
                      + feat.size * feat_itemsize * feat_reads
                      + w_p.size * c_size
                      + B * N_pad * D_out_pad * 4)

    out_p = pl.pallas_call(
        kernel,
        out_shape=jax.ShapeDtypeStruct((B, N_pad, D_out_pad), jnp.float32),
        grid_spec=pltpu.PrefetchScalarGridSpec(
            num_scalar_prefetch=0,
            grid=grid,
            in_specs=in_specs,
            out_specs=out_spec,
            scratch_shapes=[pltpu.VMEM((TM, feat_width), jnp.float32)],
        ),
        compiler_params=pltpu.CompilerParams(
            # B / row-tile axes shard across TensorCores (v7x megacore);
            # the contraction axis carries the accumulator -> "arbitrary", last.
            dimension_semantics=("parallel", "parallel", "arbitrary"),
            vmem_limit_bytes=int(vmem_limit),
        ),
        cost_estimate=pl.CostEstimate(
            flops=int(flops), transcendentals=0, bytes_accessed=int(bytes_accessed)),
    )(*inputs)

    return out_p[:, :N, :D_out].astype(out_dtype)


# ---------------------------------------------------------------------------
# Self-test
# ---------------------------------------------------------------------------
if __name__ == "__main__":
    key = jax.random.PRNGKey(0)

    def make_inputs(k, B, N, D_in, D_out, with_bias=False):
        ks = jax.random.split(k, 4)
        x = jax.random.normal(ks[0], (B, N, D_in), dtype=jnp.float32)
        adj = jax.random.uniform(ks[1], (B, N, N), dtype=jnp.float32)
        stdv = 1.0 / math.sqrt(D_out)       # reset_parameters(): U(-stdv, stdv)
        w = jax.random.uniform(ks[2], (D_in, D_out), jnp.float32,
                               minval=-stdv, maxval=stdv)
        b = (jax.random.uniform(ks[3], (D_out,), jnp.float32,
                                minval=-stdv, maxval=stdv) if with_bias else None)
        return x, adj, w, b

    def reference(x, adj, w, b=None):
        agg = jnp.einsum("bnm,bmd->bnd", adj, x, precision=jax.lax.Precision.HIGHEST)
        out = jnp.einsum("bnd,df->bnf", agg, w, precision=jax.lax.Precision.HIGHEST)
        return out if b is None else out + b

    k1, k2 = jax.random.split(key)

    # Case 1: D_in <= D_out -> fused (adj @ x) @ W path, no bias (module default).
    B, N, D_in, D_out = 2, 16, 8, 32
    x, adj, w, _ = make_inputs(k1, B, N, D_in, D_out)
    ref = reference(x, adj, w)
    out_bf16 = jax.block_until_ready(graph_convolution(x, adj, w))                 # bf16 MXU path
    out_f32 = jax.block_until_ready(graph_convolution(x, adj, w, use_bf16=False))  # f32 accuracy path
    assert out_bf16.shape == (B, N, D_out)
    assert jnp.allclose(out_f32, ref, atol=2e-3, rtol=2e-3), "f32 fused path mismatch"
    assert jnp.allclose(out_bf16, ref, atol=1e-1, rtol=5e-2), "bf16 fused path mismatch"

    # Case 2: D_out_pad < D_in_pad -> project-first adj @ (x @ W) path, with bias.
    B2, N2, D_in2, D_out2 = 2, 16, 192, 64
    x2, adj2, w2, b2 = make_inputs(k2, B2, N2, D_in2, D_out2, with_bias=True)
    ref2 = reference(x2, adj2, w2, b2)
    out2 = jax.block_until_ready(graph_convolution(x2, adj2, w2, b2))
    out2_f32 = jax.block_until_ready(graph_convolution(x2, adj2, w2, b2, use_bf16=False))
    assert out2.shape == (B2, N2, D_out2)
    assert jnp.allclose(out2_f32, ref2, atol=2e-3, rtol=2e-3), "f32 project-first mismatch"
    assert jnp.allclose(out2, ref2, atol=1e-1, rtol=5e-2), "bf16 project-first mismatch"

    print("KERNEL_OK")
</pallas_src>

<mosaic_0001>
module attributes {stable_mosaic.version = 11 : i64} {
  func.func @_gcn_fused_kernel(%arg0: i32, %arg1: i32, %arg2: i32, %arg3: memref<1x128x128xf32, #tpu.memory_space<vmem>>, %arg4: memref<1x128x128xf32, #tpu.memory_space<vmem>>, %arg5: memref<128x128xbf16, #tpu.memory_space<vmem>>, %arg6: memref<1x128xf32, #tpu.memory_space<vmem>>, %arg7: memref<1x128x128xf32, #tpu.memory_space<vmem>>, %arg8: memref<128x128xf32, #tpu.memory_space<vmem>>) attributes {dimension_semantics = [#tpu.dimension_semantics<parallel>, #tpu.dimension_semantics<parallel>, #tpu.dimension_semantics<arbitrary>], iteration_bounds = array<i64: 2, 1, 1>, scalar_prefetch = 0 : i64, scratch_operands = 1 : i64, tpu.core_type = #tpu.core_type<tc>, window_params = [{transform_indices = @transform_0, window_bounds = array<i64: 1, 128, 128>}, {transform_indices = @transform_1, window_bounds = array<i64: 1, 128, 128>}, {pipeline_mode = #tpu.pipeline_mode<synchronous>, transform_indices = @transform_2, window_bounds = array<i64: 128, 128>}, {pipeline_mode = #tpu.pipeline_mode<synchronous>, transform_indices = @transform_3, window_bounds = array<i64: 1, 128>}, {transform_indices = @transform_4, window_bounds = array<i64: 1, 128, 128>}]} {
    %c0 = arith.constant 0 : index
    %c0_0 = arith.constant 0 : index
    %c0_1 = arith.constant 0 : index
    %0 = vector.load %arg3[%c0, %c0_0, %c0_1] : memref<1x128x128xf32, #tpu.memory_space<vmem>>, vector<1x128x128xf32>
    %1 = vector.shape_cast %0 : vector<1x128x128xf32> to vector<128x128xf32>
    %2 = arith.truncf %1 : vector<128x128xf32> to vector<128x128xbf16>
    %c128_i32 = arith.constant 128 : i32
    %3 = arith.muli %arg2, %c128_i32 : i32
    %4 = tpu.assume_multiple %3, 128 : i32
    %c0_2 = arith.constant 0 : index
    %5 = arith.index_cast %4 : i32 to index
    %c0_3 = arith.constant 0 : index
    %6 = vector.load %arg4[%c0_2, %5, %c0_3] : memref<1x128x128xf32, #tpu.memory_space<vmem>>, vector<1x128x128xf32>
    %7 = vector.shape_cast %6 : vector<1x128x128xf32> to vector<128x128xf32>
    %8 = arith.truncf %7 : vector<128x128xf32> to vector<128x128xbf16>
    %cst = arith.constant dense<0.000000e+00> : vector<128x128xf32>
    %9 = tpu.matmul %2, %8, %cst {dimension_numbers = #tpu.dot_dimension_numbers<[1], [0], [0], [1], [0, 0, 1, 1], [], []>} : vector<128x128xbf16>, vector<128x128xbf16>, vector<128x128xf32> -> vector<128x128xf32>
    %c0_i32 = arith.constant 0 : i32
    %10 = arith.cmpi eq, %arg2, %c0_i32 : i32
    %11 = arith.extui %10 : i1 to i32
    %c0_i32_4 = arith.constant 0 : i32
    %12 = arith.cmpi ne, %11, %c0_i32_4 : i32
    scf.if %12 {
      %c0_9 = arith.constant 0 : index
      %c0_10 = arith.constant 0 : index
      %19 = vector.load %arg8[%c0_9, %c0_10] : memref<128x128xf32, #tpu.memory_space<vmem>>, vector<128x128xf32>
      tpu.vector_store %arg8[%c0_9, %c0_10], %9 {strides = array<i32>} : memref<128x128xf32, #tpu.memory_space<vmem>>, vector<128x128xf32>,
    } else {
    }
    %c0_i32_5 = arith.constant 0 : i32
    %13 = arith.cmpi sgt, %arg2, %c0_i32_5 : i32
    %14 = arith.extui %13 : i1 to i32
    %c0_i32_6 = arith.constant 0 : i32
    %15 = arith.cmpi ne, %14, %c0_i32_6 : i32
    scf.if %15 {
      %c0_9 = arith.constant 0 : index
      %c0_10 = arith.constant 0 : index
      %19 = vector.load %arg8[%c0_9, %c0_10] : memref<128x128xf32, #tpu.memory_space<vmem>>, vector<128x128xf32>
      %20 = arith.addf %19, %9 : vector<128x128xf32>
      %c0_11 = arith.constant 0 : index
      %c0_12 = arith.constant 0 : index
      %21 = vector.load %arg8[%c0_11, %c0_12] : memref<128x128xf32, #tpu.memory_space<vmem>>, vector<128x128xf32>
      tpu.vector_store %arg8[%c0_11, %c0_12], %20 {strides = array<i32>} : memref<128x128xf32, #tpu.memory_space<vmem>>, vector<128x128xf32>,
    } else {
    }
    %c0_i32_7 = arith.constant 0 : i32
    %16 = arith.cmpi eq, %arg2, %c0_i32_7 : i32
    %17 = arith.extui %16 : i1 to i32
    %c0_i32_8 = arith.constant 0 : i32
    %18 = arith.cmpi ne, %17, %c0_i32_8 : i32
    scf.if %18 {
      %c0_9 = arith.constant 0 : index
      %c0_10 = arith.constant 0 : index
      %19 = vector.load %arg8[%c0_9, %c0_10] : memref<128x128xf32, #tpu.memory_space<vmem>>, vector<128x128xf32>
      %20 = arith.truncf %19 : vector<128x128xf32> to vector<128x128xbf16>
      %c0_11 = arith.constant 0 : index
      %c0_12 = arith.constant 0 : index
      %21 = vector.load %arg5[%c0_11, %c0_12] : memref<128x128xbf16, #tpu.memory_space<vmem>>, vector<128x128xbf16>
      %cst_13 = arith.constant dense<0.000000e+00> : vector<128x128xf32>
      %22 = tpu.matmul %20, %21, %cst_13 {dimension_numbers = #tpu.dot_dimension_numbers<[1], [0], [0], [1], [0, 0, 1, 1], [], []>} : vector<128x128xbf16>, vector<128x128xbf16>, vector<128x128xf32> -> vector<128x128xf32>
      %c0_14 = arith.constant 0 : index
      %c0_15 = arith.constant 0 : index
      %23 = vector.load %arg6[%c0_14, %c0_15] : memref<1x128xf32, #tpu.memory_space<vmem>>, vector<1x128xf32>
      %24 = vector.broadcast %23 : vector<1x128xf32> to vector<128x128xf32>
      %25 = arith.addf %22, %24 : vector<128x128xf32>
      %c0_16 = arith.constant 0 : index
      %c0_17 = arith.constant 0 : index
      %c0_18 = arith.constant 0 : index
      %26 = vector.load %arg7[%c0_16, %c0_17, %c0_18] : memref<1x128x128xf32, #tpu.memory_space<vmem>>, vector<1x128x128xf32>
      %27 = vector.shape_cast %26 : vector<1x128x128xf32> to vector<128x128xf32>
      %28 = vector.shape_cast %25 : vector<128x128xf32> to vector<1x128x128xf32>
      tpu.vector_store %arg7[%c0_16, %c0_17, %c0_18], %28 {strides = array<i32>} : memref<1x128x128xf32, #tpu.memory_space<vmem>>, vector<1x128x128xf32>,
    } else {
    }
    return
  }
  func.func @transform_0(%arg0: i32, %arg1: i32, %arg2: i32) -> (i32, i32, i32) {
    %c0_i32 = arith.constant 0 : i32
    return %arg0, %arg1, %arg2 : i32, i32, i32
  }
  func.func @transform_1(%arg0: i32, %arg1: i32, %arg2: i32) -> (i32, i32, i32) {
    %c0_i32 = arith.constant 0 : i32
    %c0_i32_0 = arith.constant 0 : i32
    %c0_i32_1 = arith.constant 0 : i32
    return %arg0, %c0_i32, %c0_i32_0 : i32, i32, i32
  }
  func.func @transform_2(%arg0: i32, %arg1: i32, %arg2: i32) -> (i32, i32) {
    %c0_i32 = arith.constant 0 : i32
    %c0_i32_0 = arith.constant 0 : i32
    %c0_i32_1 = arith.constant 0 : i32
    return %c0_i32, %c0_i32_0 : i32, i32
  }
  func.func @transform_3(%arg0: i32, %arg1: i32, %arg2: i32) -> (i32, i32) {
    %c0_i32 = arith.constant 0 : i32
    %c0_i32_0 = arith.constant 0 : i32
    %c0_i32_1 = arith.constant 0 : i32
    return %c0_i32, %c0_i32_0 : i32, i32
  }
  func.func @transform_4(%arg0: i32, %arg1: i32, %arg2: i32) -> (i32, i32, i32) {
    %c0_i32 = arith.constant 0 : i32
    %c0_i32_0 = arith.constant 0 : i32
    return %arg0, %arg1, %c0_i32 : i32, i32, i32
  }
}

</mosaic_0001>

<bundles_post_ra>
// kernel: tpu_custom_call.1
= control target key start
LH: loop header
LB: loop body
LE: loop exit
PB: predicated region body
PF: predicated region fallthrough
CT: control target
= control target key end

     0   :  { %s1376_s0 = inlined_call_operand.hbm [shape: f32[2,128,128], index: 0, kind: input, shape index: {}]   ;;  %s1377_s1 = inlined_call_operand.hbm [shape: f32[2,128,128], index: 1, kind: input, shape index: {}]   ;;  %s1378_s2 = inlined_call_operand.hbm [shape: bf16[128,128], index: 2, kind: input, shape index: {}]   ;;  %s1379_s3 = inlined_call_operand.vmem [shape: f32[1,128], index: 3, kind: input, shape index: {}]   ;;  %s1380_s4 = inlined_call_operand.hbm [shape: f32[2,128,128], index: 4, kind: output, shape index: {}]  }
   0x1   :  { %1384 = sst [smem:[#allocation18_spill]] %s1378_s2 }
   0x2   :  { %9 = vsyncpa [#allocation4], 0 }
   0x3   :  { %11 = vsyncpa [#allocation4 + $0x1], 0 }
   0x4   :  { %12 = vsyncpa [#allocation7], 0 }
   0x5   :  { %14 = vsyncpa [#allocation7 + $0x1], 0 }
   0x6   :  { %15 = vsyncpa [#allocation5], 0 }
   0x7   :  { %17 = vsyncpa [#allocation5 + $0x1], 0  ;;  %s1159_s15 = smov 0   ;;  %s1161_s16 = smov 0  }
   0x8   :  { %s1163_s17 = smov 0   ;;  %s1165_s18 = smov 0  }
   0x9   :  { %s1167_s19 = smov 0   ;;  %s1169_s20 = smov 0  }
   0xa LB: > { %1385 = sst [smem:[#allocation14_spill]] %s1113_s17  ;;  %s1190_s21 = sadd.s32 4294967295, %s1125_s20   ;;  %s1125_s20 = sphi %s1169_s20, %s23_s20   ;;  %s1121_s19 = sphi %s1167_s19, %s1401_s19   ;;  %s1117_s18 = sphi %s1165_s18, %s1397_s18   ;;  %s1113_s17 = sphi %s1163_s17, %s1396_s17   ;;  %s1109_s16 = sphi %s1161_s16, %s1400_s16   ;;  %s1105_s15 = sphi %s1159_s15, %s1399_s15  }
   0xb   : > { %1386 = sst [smem:[#allocation15_spill]] %s1121_s19  ;;  %s781_s22 = sadd.s32 4294967294, %s1125_s20  }
   0xc   : > { %p66_p0 = scmp.ne.s32.totalorder %s1109_s16, %s1105_s15  ;;  %p67_p1 = scmp.eq.s32.totalorder %s1190_s21, 0 }
   0xd   : > { %p160_p2 = scmp.eq.s32.totalorder %s1190_s21, 1  ;;  %p166_p3 = scmp.eq.s32.totalorder %s781_s22, 1 }
   0xe   : > { %p1199_p4 = por %p67_p1, %p66_p0  ;;  %p782_p5 = scmp.ge.s32.totalorder %s1125_s20, 1 }
   0xf   : > { %p1204_p6 = por %p166_p3, %p66_p0  ;;  %p173_p7 = scmp.lt.s32.totalorder %s1125_s20, 3 }
  0x10   : > { %s1389_s2 = sld [smem:[#allocation18_spill]]  ;;  %s1127_s29 = smov [#allocation8]  }
  0x11   : > { %p1212_p8 = pnand %p782_p5, %p173_p7  ;;  %s186_s30 = sshll.u32 %s1127_s29, 4  ;;  %s187_s30 = int_to_ptr.vmem [resolvable:$true] %s186_s30 }
  0x12   : > { %p784_p11 = scmp.ge.s32.totalorder %s1125_s20, 2  ;;  %s1128_s5 = smov 64  }
  0x13   : > { %p870_p9 = pneg %p1212_p8  ;;  %s1129_s6 = smov 4  }
  0x14   : > { %s42_s7 = sadd.s32 1, %s1121_s19  ;;  %s53_s8 = sadd.s32 1, %s1113_s17 }
  0x15   : > { %p871_p10 = pnand %p870_p9, %p67_p1  ;;  %p44_p12 = scmp.ge.s32.totalorder %s42_s7, 2 }
  0x16   : > { %s184_s27 = sshll.u32 %s1389_s2, 4  ;;  %p60_p13 = scmp.ne.s32.totalorder %s1113_s17, %s1109_s16  ;;  %s185_s27 = int_to_ptr.hbm [resolvable:$true] %s184_s27 }
  0x17   : > { %873 = dma.hbm_to_vmem [thread:$0]  (!%p871_p10), %s185_s27, 1024, %s187_s30, [#allocation7], %s1128_s5, %s1128_s5, %s1129_s6  }
  0x18   : > { %p61_p0 = scmp.eq.s32.totalorder %s1125_s20, 0  ;;  %s1403_s7 = smov (%p44_p12, %s42_s7), 0 }
  0x19   : > { %1391 = sst [smem:[#allocation16_spill]] %s1403_s7  ;;  %p1234_p5 = por %p160_p2, %p60_p13 }
  0x1a   : > { %p1228_p3 = por %p61_p0, %p60_p13  ;;  %s46_s11 = ssub.s32 %s1121_s19, %s1403_s7 }
  0x1b   : > { %p886_p7 = scmp.lt.s32.totalorder %s1125_s20, 2  ;;  %p51_p9 = scmp.eq.s32.totalorder %s46_s11, 0 }
  0x1c   : > { %s203_s12 = sand.u32 1, %s1113_s17   ;;  %s833_s22 = sshll.u32 %s1121_s19, 7 }
  0x1d   : > { %s785_s13 = sshll.u32 %s203_s12, 7  ;;  %s215_s27 = scalar_lea.hbm %s1376_s0, %s833_s22 }
  0x1e   : > { %s1243_s14 = scalar_select %p51_p9, %s1113_s17, %s53_s8  }
  0x1f   : > { %s207_s29 = scalar_lea.vmem [#allocation3], %s785_s13  ;;  %s216_s5 = sshll.u32 %s215_s27, 4  ;;  %s217_s5 = int_to_ptr.hbm [resolvable:$true] %s216_s5 }
  0x20   : > { %1394 = sst [smem:[#allocation17_spill]] %s1243_s14  ;;  %s218_s30 = sshll.u32 %s207_s29, 4  ;;  %s219_s30 = int_to_ptr.vmem [resolvable:$true] %s218_s30 }
  0x21   : > { %p875_p2 = pnand %p886_p7, %p1228_p3  ;;  %s204_s6 = scalar_lea.sflag [#allocation4], %s203_s12 }
  0x22   : > { %s1130_s2 = smov 128   ;;  %s1131_s11 = smov 8  }
  0x23   : > { %877 = dma.hbm_to_vmem [thread:$0]  (!%p875_p2), %s217_s5, 2048, %s219_s30, %s204_s6, %s1130_s2, %s1130_s2, %s1131_s11  }
  0x24   : > { %s237_s19 = scalar_lea.hbm %s1377_s1, %s833_s22  ;;  %s232_s14 = scalar_lea.vmem [#allocation6], %s785_s13 }
  0x25   : > { %s240_s17 = sshll.u32 %s232_s14, 4  ;;  %s238_s25 = sshll.u32 %s237_s19, 4  ;;  %s241_s17 = int_to_ptr.vmem [resolvable:$true] %s240_s17  ;;  %s239_s25 = int_to_ptr.hbm [resolvable:$true] %s238_s25 }
  0x26   : > { %s228_s26 = sand.u32 1, %s1125_s20   ;;  %252 = sbr.rel (%p1212_p8) target bundleno = 419 (0x1a3), region = 36 }
  0x27   : > { %s229_s29 = scalar_lea.sflag [#allocation7], %s228_s26  ;;  %s1258_s9 = sand.u32 (!%p1212_p8), 1, %s1109_s16  }
  0x28   : > { %880 = dma.hbm_to_vmem [thread:$0]  (!%p875_p2), %s239_s25, 2048, %s241_s17, %s229_s29, %s1130_s2, %s1130_s2, %s1131_s11  }
  0x29   : > { %s1261_s12 = sshll.u32 (!%p1212_p8), %s1258_s9, 7  ;;  %s255_s7 = scalar_lea.sflag (!%p1212_p8), [#allocation4], %s1258_s9 }
  0x2a   : > { %s1265_s13 = scalar_lea.vmem (!%p1212_p8), [#allocation3], %s1261_s12 }
  0x2b   : > { %1088 = dma.done.wait (%p1199_p4), %s255_s7, 2048  }
  0x2c   : > { %1090 = vsyncadd (%p1199_p4), %s255_s7, 4294965248  ;;  %s264_s2 = sand.u32 1, %s1190_s21   ;;  %s1273_s19 = scalar_lea.vmem [#allocation6], %s1261_s12 }
  0x2d   : > { %s265_s17 = scalar_lea.sflag [#allocation7], %s264_s2 }
  0x2e   : > { %1092 = dma.done.wait (%p1199_p4), %s265_s17, 2048  }
  0x2f   : > { %1094 = vsyncadd (%p1199_p4), %s265_s17, 4294965248 }
  0x30   : > { %1096 = dma.done.wait (%p67_p1), [#allocation7], 1024  }
  0x31   : > { %1098 = vsyncadd (%p67_p1), [#allocation7], 4294966272  ;;  %v346_v0 = vld [vmem:[%s1273_s19 + $0x70] sm:$0xff]  ;;  %v347_v1 = vld [vmem:[%s1273_s19 + $0x78] sm:$0xff]  ;;  %s1319_s28 = scalar_lea.vmem [#allocation9], %s1261_s12  ;;  %s843_s14 = sshll.u32 %s1117_s18, 7 }
  0x32   : > { %v344_v2 = vld [vmem:[%s1273_s19 + $0x60] sm:$0xff]  ;;  %v355_v3 = vpack.c.bf16 %v347_v1, %v346_v0  ;;  %v345_v4 = vld [vmem:[%s1273_s19 + $0x68] sm:$0xff]  ;;  %v342_v6 = vld [vmem:[%s1273_s19 + $0x50] sm:$0xff]  ;;  %s651_s30 = scalar_lea.hbm %s1380_s4, %s843_s14  ;;  %s652_s5 = sshll.u32 %s1319_s28, 4  ;;  %s653_s5 = int_to_ptr.vmem [resolvable:$true] %s652_s5 }
  0x33   : > { %v354_v5 = vpack.c.bf16 %v345_v4, %v344_v2  ;;  %v343_v7 = vld [vmem:[%s1273_s19 + $0x58] sm:$0xff]  ;;  %v340_v9 = vld [vmem:[%s1273_s19 + $0x40] sm:$0xff]  ;;  %v341_v10 = vld [vmem:[%s1273_s19 + $0x48] sm:$0xff]  ;;  %s654_s6 = sshll.u32 %s651_s30, 4  ;;  %s638_s11 = scalar_lea.sflag [#allocation5], %s1258_s9  ;;  %s655_s6 = int_to_ptr.hbm [resolvable:$true] %s654_s6 }
  0x34   : > { %356 = vmatpush.bf16.msra.mxu0 %v355_v3  ;;  %844 = vmatpush.bf16.msra.mxu2 %v355_v3  ;;  %v353_v8 = vpack.c.bf16 %v343_v7, %v342_v6  ;;  %v352_v11 = vpack.c.bf16 %v341_v10, %v340_v9  ;;  %v338_v12 = vld [vmem:[%s1273_s19 + $0x30] sm:$0xff]  ;;  %v339_v13 = vld [vmem:[%s1273_s19 + $0x38] sm:$0xff]  ;;  %v336_v15 = vld [vmem:[%s1273_s19 + $0x20] sm:$0xff]  ;;  %s1049_s8 = sshra.s32 %s655_s6, 4  ;;  %s1055_s29 = scalar_lea.hbm %s1380_s4, 256  ;;  %s1050_s8 = int_to_ptr.hbm [resolvable:$true] %s1049_s8 }
  0x35   : > { %v351_v14 = vpack.c.bf16 %v339_v13, %v338_v12  ;;  %v337_v16 = vld [vmem:[%s1273_s19 + $0x28] sm:$0xff]  ;;  %v334_v18 = vld [vmem:[%s1273_s19 + $0x10] sm:$0xff]  ;;  %v335_v19 = vld [vmem:[%s1273_s19 + $0x18] sm:$0xff]  ;;  %s1051_s25 = scalar_lea.hbm %s1050_s8, 128  ;;  %p1056_p10 = scmp.lt.s32.totalorder %s1050_s8, %s1380_s4 }
  0x36   : > { %v350_v17 = vpack.c.bf16 %v337_v16, %v336_v15  ;;  %v349_v20 = vpack.c.bf16 %v335_v19, %v334_v18  ;;  %v332_v21 = vld [vmem:[%s1273_s19] sm:$0xff]  ;;  %v333_v22 = vld [vmem:[%s1273_s19 + $0x8] sm:$0xff]  ;;  %v308_v30 = vld [vmem:[%s1265_s13 + $0x10] sm:$0xff]  ;;  %p1052_p1 = scmp.ne.s32.totalorder %s1050_s8, %s1051_s25  ;;  %p1057_p12 = scmp.lt.s32.totalorder %s1055_s29, %s1051_s25 }
  0x37   : > { %v306_v23 = vld [vmem:[%s1265_s13] sm:$0xff]  ;;  %v348_v24 = vpack.c.bf16 %v333_v22, %v332_v21  ;;  %v307_v25 = vld [vmem:[%s1265_s13 + $0x8] sm:$0xff]  ;;  %v309_v31 = vld [vmem:[%s1265_s13 + $0x18] sm:$0xff] }
  0x38   : > { %357 = vmatpush.bf16.msra.mxu0 %v354_v5  ;;  %845 = vmatpush.bf16.msra.mxu2 %v354_v5  ;;  %v314_v26 = vld [vmem:[%s1265_s13 + $0x40] sm:$0xff]  ;;  %v315_v27 = vld [vmem:[%s1265_s13 + $0x48] sm:$0xff]  ;;  %v322_v28 = vpack.c.bf16 %v307_v25, %v306_v23  ;;  %v316_v32 = vld [vmem:[%s1265_s13 + $0x50] sm:$0xff]  ;;  %v323_v34 = vpack.c.bf16 %v309_v31, %v308_v30  ;;  %p1053_p4 = pnand %p1052_p1, %p1234_p5  ;;  %p1058_p13 = por %p1057_p12, %p1056_p10 }
  0x39   : > { %v326_v29 = vpack.c.bf16 %v315_v27, %v314_v26  ;;  %v317_v33 = vld [vmem:[%s1265_s13 + $0x58] sm:$0xff]  ;;  %v841_v37 = vld [vmem:[#allocation8 + $0x30] sm:$0xff]  ;;  %v840_v38 = vld [vmem:[#allocation8 + $0x28] sm:$0xff] }
  0x3a   : > { %v327_v35 = vpack.c.bf16 %v317_v33, %v316_v32  ;;  %v842_v36 = vld [vmem:[#allocation8 + $0x38] sm:$0xff]  ;;  %v310_v39 = vld [vmem:[%s1265_s13 + $0x20] sm:$0xff]  ;;  %v311_v40 = vld [vmem:[%s1265_s13 + $0x28] sm:$0xff]  ;;  %p1054_p8 = pneg %p1053_p4 }
  0x3b   : > { %572 = vmatpush.bf16.msra.mxu1 %v842_v36  ;;  %852 = vmatpush.bf16.msra.mxu3 %v842_v36  ;;  %v318_v41 = vld [vmem:[%s1265_s13 + $0x60] sm:$0xff]  ;;  %v319_v42 = vld [vmem:[%s1265_s13 + $0x68] sm:$0xff]  ;;  %v324_v44 = vpack.c.bf16 %v311_v40, %v310_v39  ;;  %v838_v46 = vld [vmem:[#allocation8 + $0x18] sm:$0xff] }
  0x3c   : > { %358 = vmatpush.bf16.msra.mxu0 %v353_v8  ;;  %846 = vmatpush.bf16.msra.mxu2 %v353_v8  ;;  %v839_v43 = vld [vmem:[#allocation8 + $0x20] sm:$0xff]  ;;  %v328_v45 = vpack.c.bf16 %v319_v42, %v318_v41  ;;  %v312_v47 = vld [vmem:[%s1265_s13 + $0x30] sm:$0xff]  ;;  %v313_v48 = vld [vmem:[%s1265_s13 + $0x38] sm:$0xff]  ;;  %p1059_p0 = pnand %p1058_p13, %p1054_p8 }
  0x3d   : > { %v320_v49 = vld [vmem:[%s1265_s13 + $0x70] sm:$0xff]  ;;  %v321_v50 = vld [vmem:[%s1265_s13 + $0x78] sm:$0xff]  ;;  %v325_v51 = vpack.c.bf16 %v313_v48, %v312_v47  ;;  %v836_v54 = vld [vmem:[#allocation8 + $0x8] sm:$0xff] }
  0x3e   : > { %v329_v52 = vpack.c.bf16 %v321_v50, %v320_v49  ;;  %v837_v53 = vld [vmem:[#allocation8 + $0x10] sm:$0xff]  ;;  %v835_v55 = vld [vmem:[#allocation8] sm:$0xff] }
  0x3f   : > { %573 = vmatpush.bf16.msra.mxu1 %v841_v37  ;;  %853 = vmatpush.bf16.msra.mxu3 %v841_v37  ;;  %v944_v16 = vld [vmem:[%s1379_s3] ss:$0 sm:$0xff] }
  0x40   : > { %359 = vmatpush.bf16.msra.mxu0 %v352_v11  ;;  %847 = vmatpush.bf16.msra.mxu2 %v352_v11 }
  0x43   : > { %574 = vmatpush.bf16.msra.mxu1 %v840_v38  ;;  %854 = vmatpush.bf16.msra.mxu3 %v840_v38 }
  0x44   : > { %360 = vmatpush.bf16.msra.mxu0 %v351_v14  ;;  %848 = vmatpush.bf16.msra.mxu2 %v351_v14 }
  0x47   : > { %575 = vmatpush.bf16.msra.mxu1 %v839_v43  ;;  %855 = vmatpush.bf16.msra.mxu3 %v839_v43 }
  0x48   : > { %361 = vmatpush.bf16.msra.mxu0 %v350_v17  ;;  %849 = vmatpush.bf16.msra.mxu2 %v350_v17 }
  0x4b   : > { %576 = vmatpush.bf16.msra.mxu1 %v838_v46  ;;  %856 = vmatpush.bf16.msra.mxu3 %v838_v46 }
  0x4c   : > { %362 = vmatpush.bf16.msra.mxu0 %v349_v20  ;;  %850 = vmatpush.bf16.msra.mxu2 %v349_v20 }
  0x4f   : > { %577 = vmatpush.bf16.msra.mxu1 %v837_v53  ;;  %857 = vmatpush.bf16.msra.mxu3 %v837_v53 }
  0x50   : > { %363 = vmatpush.bf16.msra.mxu0 %v348_v24  ;;  %851 = vmatpush.bf16.msra.mxu2 %v348_v24 }
  0x53   : > { %364 = vmatmul.bf16.vlgmr.msra.gmra.mxu0 %v322_v28  ;;  %384 = vmatmul.bf16.vlgmr.msra.gmra.mxu2 %v326_v29 }
  0x54   : > { %578 = vmatpush.bf16.msra.mxu1 %v836_v54  ;;  %858 = vmatpush.bf16.msra.mxu3 %v836_v54 }
  0x58   : > { %579 = vmatpush.bf16.msra.mxu1 %v835_v55  ;;  %859 = vmatpush.bf16.msra.mxu3 %v835_v55 }
  0x63   : > { %369 = vmatmul.bf16.gmra.mxu0 %v323_v34  ;;  %389 = vmatmul.bf16.gmra.mxu2 %v327_v35 }
  0x73   : > { %374 = vmatmul.bf16.gmra.mxu0 %v324_v44  ;;  %394 = vmatmul.bf16.gmra.mxu2 %v328_v45 }
  0x83   : > { %379 = vmatmul.bf16.gmra.mxu0 %v325_v51  ;;  %399 = vmatmul.bf16.gmra.mxu2 %v329_v52 }
  0xd0   : > { %v365_v56 = vpop.f32.mrf.mxu0 }
  0xd6   : > { %v385_v57 = vpop.f32.mrf.mxu2 }
  0xd8   : > { %v367_v58 = vpop.f32.mrf.mxu0 }
  0xd9   : > { %v496_v59 = vpack.c.bf16 %v367_v58, %v365_v56 }
  0xdb   : > { %580 = vmatmul.bf16.vlgmr.msra.gmra.mxu1 %v496_v59 }
  0xde   : > { %v387_v60 = vpop.f32.mrf.mxu2 }
  0xdf   : > { %v500_v61 = vpack.c.bf16 %v387_v60, %v385_v57 }
  0xe0   : > { %v370_v62 = vpop.f32.mrf.mxu0 }
  0xe1   : > { %600 = vmatmul.bf16.vlgmr.msra.gmra.mxu3 %v500_v61 }
  0xe6   : > { %v390_v63 = vpop.f32.mrf.mxu2 }
  0xe8   : > { %v372_v0 = vpop.f32.mrf.mxu0 }
  0xe9   : > { %v497_v1 = vpack.c.bf16 %v372_v0, %v370_v62 }
  0xeb   : > { %585 = vmatmul.bf16.gmra.mxu1 %v497_v1 }
  0xee   : > { %v392_v2 = vpop.f32.mrf.mxu2 }
  0xef   : > { %v501_v3 = vpack.c.bf16 %v392_v2, %v390_v63 }
  0xf0   : > { %v375_v4 = vpop.f32.mrf.mxu0 }
  0xf1   : > { %605 = vmatmul.bf16.gmra.mxu3 %v501_v3 }
  0xf6   : > { %v395_v5 = vpop.f32.mrf.mxu2 }
  0xf8   : > { %v377_v6 = vpop.f32.mrf.mxu0 }
  0xf9   : > { %v498_v7 = vpack.c.bf16 %v377_v6, %v375_v4 }
  0xfb   : > { %590 = vmatmul.bf16.gmra.mxu1 %v498_v7 }
  0xfe   : > { %v397_v8 = vpop.f32.mrf.mxu2 }
  0xff   : > { %v502_v9 = vpack.c.bf16 %v397_v8, %v395_v5 }
 0x100   : > { %v380_v10 = vpop.f32.mrf.mxu0 }
 0x101   : > { %610 = vmatmul.bf16.gmra.mxu3 %v502_v9 }
 0x106   : > { %v400_v11 = vpop.f32.mrf.mxu2 }
 0x108   : > { %v382_v12 = vpop.f32.mrf.mxu0 }
 0x109   : > { %v499_v13 = vpack.c.bf16 %v382_v12, %v380_v10 }
 0x10b   : > { %595 = vmatmul.bf16.gmra.mxu1 %v499_v13 }
 0x10e   : > { %v402_v14 = vpop.f32.mrf.mxu2 }
 0x10f   : > { %v503_v15 = vpack.c.bf16 %v402_v14, %v400_v11 }
 0x111   : > { %615 = vmatmul.bf16.gmra.mxu3 %v503_v15 }
 0x158   : > { %v581_v17 = vpop.f32.mrf.mxu1 }
 0x159   : > { %v582_v18 = vadd.f32 %v944_v16, %v581_v17 }
 0x15b   : > { %621 = vst [vmem:[%s1319_s28] sm:$0xff] %v582_v18 }
 0x160   : > { %v583_v19 = vpop.f32.mrf.mxu1 }
 0x161   : > { %v584_v20 = vadd.f32 %v944_v16, %v583_v19 }
 0x163   : > { %622 = vst [vmem:[%s1319_s28 + $0x8] sm:$0xff] %v584_v20 }
 0x164   : > { %v601_v21 = vpop.f32.mrf.mxu3 }
 0x165   : > { %v602_v22 = vadd.f32 %v944_v16, %v601_v21 }
 0x167   : > { %629 = vst [vmem:[%s1319_s28 + $0x40] sm:$0xff] %v602_v22 }
 0x168   : > { %v586_v23 = vpop.f32.mrf.mxu1 }
 0x169   : > { %v587_v24 = vadd.f32 %v944_v16, %v586_v23 }
 0x16b   : > { %623 = vst [vmem:[%s1319_s28 + $0x10] sm:$0xff] %v587_v24 }
 0x16c   : > { %v603_v25 = vpop.f32.mrf.mxu3 }
 0x16d   : > { %v604_v26 = vadd.f32 %v944_v16, %v603_v25 }
 0x16f   : > { %630 = vst [vmem:[%s1319_s28 + $0x48] sm:$0xff] %v604_v26 }
 0x170   : > { %v588_v27 = vpop.f32.mrf.mxu1 }
 0x171   : > { %v589_v28 = vadd.f32 %v944_v16, %v588_v27 }
 0x173   : > { %624 = vst [vmem:[%s1319_s28 + $0x18] sm:$0xff] %v589_v28 }
 0x174   : > { %v606_v29 = vpop.f32.mrf.mxu3 }
 0x175   : > { %v607_v30 = vadd.f32 %v944_v16, %v606_v29 }
 0x177   : > { %631 = vst [vmem:[%s1319_s28 + $0x50] sm:$0xff] %v607_v30 }
 0x178   : > { %v591_v31 = vpop.f32.mrf.mxu1 }
 0x179   : > { %v592_v32 = vadd.f32 %v944_v16, %v591_v31 }
 0x17b   : > { %625 = vst [vmem:[%s1319_s28 + $0x20] sm:$0xff] %v592_v32 }
 0x17c   : > { %v608_v33 = vpop.f32.mrf.mxu3 }
 0x17d   : > { %v609_v34 = vadd.f32 %v944_v16, %v608_v33 }
 0x17f   : > { %632 = vst [vmem:[%s1319_s28 + $0x58] sm:$0xff] %v609_v34 }
 0x180   : > { %v593_v35 = vpop.f32.mrf.mxu1 }
 0x181   : > { %v594_v36 = vadd.f32 %v944_v16, %v593_v35 }
 0x183   : > { %626 = vst [vmem:[%s1319_s28 + $0x28] sm:$0xff] %v594_v36 }
 0x184   : > { %v611_v37 = vpop.f32.mrf.mxu3 }
 0x185   : > { %v612_v38 = vadd.f32 %v944_v16, %v611_v37 }
 0x187   : > { %633 = vst [vmem:[%s1319_s28 + $0x60] sm:$0xff] %v612_v38 }
 0x188   : > { %v596_v39 = vpop.f32.mrf.mxu1 }
 0x189   : > { %v597_v40 = vadd.f32 %v944_v16, %v596_v39 }
 0x18b   : > { %627 = vst [vmem:[%s1319_s28 + $0x30] sm:$0xff] %v597_v40 }
 0x18c   : > { %v613_v41 = vpop.f32.mrf.mxu3 }
 0x18d   : > { %v614_v42 = vadd.f32 %v944_v16, %v613_v41 }
 0x18f   : > { %634 = vst [vmem:[%s1319_s28 + $0x68] sm:$0xff] %v614_v42 }
 0x190   : > { %v598_v43 = vpop.f32.mrf.mxu1 }
 0x191   : > { %v599_v44 = vadd.f32 %v944_v16, %v598_v43 }
 0x193   : > { %628 = vst [vmem:[%s1319_s28 + $0x38] sm:$0xff] %v599_v44 }
 0x194   : > { %v616_v45 = vpop.f32.mrf.mxu3 }
 0x195   : > { %v617_v46 = vadd.f32 %v944_v16, %v616_v45 }
 0x197   : > { %635 = vst [vmem:[%s1319_s28 + $0x70] sm:$0xff] %v617_v46 }
 0x19c   : > { %v618_v47 = vpop.f32.mrf.mxu3 }
 0x19d   : > { %v619_v48 = vadd.f32 %v944_v16, %v618_v47 }
 0x19f   : > { %636 = vst [vmem:[%s1319_s28 + $0x78] sm:$0xff] %v619_v48 }
 0x1a0   : > { %1062 = shalt.err (!%p1059_p0)
}
 0x1a1   : > { %s1132_s9 = smov 128   ;;  %s1133_s13 = smov 8  }
 0x1a2   : > { %868 = dma.vmem_to_hbm [thread:$0]  (%p1234_p5), %s653_s5, 2048, %s655_s6, %s638_s11, %s1132_s9, %s1132_s9, %s1133_s13  }
 0x1a3 PF: > { %s669_s2 = sand.u32 1, %s1105_s15   ;;  %p882_p3 = pnand %p784_p11, %p1204_p6 }
 0x1a4   : > { %s670_s17 = scalar_lea.sflag [#allocation5], %s669_s2 }
 0x1a5   : > { %p883_p7 = pneg %p882_p3 }
 0x1a7   : > { %1100 = dma.done.wait (%p883_p7), %s670_s17, 2048  }
 0x1a8   : > { %1102 = vsyncadd (%p883_p7), %s670_s17, 4294965248  ;;  %s23_s20 = sadd.s32 1, %s1125_s20   ;;  %s1395_s19 = sld [smem:[#allocation14_spill]] }
 0x1a9   : > { %p20_p9 = scmp.ge.s32.totalorder %s23_s20, 4   ;;  %s1396_s17 = sld [smem:[#allocation17_spill]] }
 0x1aa   : > { %s1397_s18 = sld [smem:[#allocation15_spill]]  ;;  %s1399_s15 = smov %s1109_s16 }
 0x1ab   : > { %s1398_s10 = sld [smem:[#allocation16_spill]] }
 0x1ad   :  { %22 = sbr.rel (!%p20_p9) target bundleno = 10 (0xa), region = 111 }
 0x1ae   : > { %s1400_s16 = smov %s1395_s19 }
 0x1b1   : > { %s1401_s19 = smov %s1398_s10 }
 0x1b2   :  { %676 = vsyncpa [#allocation4], 1 }
 0x1b3   :  { %678 = vsyncpa [#allocation4 + $0x1], 1 }
 0x1b4   :  { %679 = vsyncpa [#allocation7], 1 }
 0x1b5   :  { %681 = vsyncpa [#allocation7 + $0x1], 1 }
 0x1b6   :  { %682 = vsyncpa [#allocation5], 1 }
 0x1b7   :  { %684 = vsyncpa [#allocation5 + $0x1], 1 }

</bundles_post_ra>
